<compile_context>
chip_gen: v7x
topology: tpu7x:2x2x1
jax: 0.10.0
libtpu: 0.0.40
codegen_flags: <defaults>
</compile_context>

<pallas_src>
import functools

import jax
import jax.numpy as jnp
from jax.experimental import pallas as pl
from jax.experimental.pallas import tpu as pltpu

_PAD_SENTINEL = 1e30  # finite "very far" half-norm for padded columns


def _batch_hard_kernel(xr_ref, xc_ref, nrh_ref, nch_ref, labr_ref, labc_ref,
                       hinge_ref, ap2_sc, an2_sc, *, margin, eps, tn):
    """One (row-tile i, column-tile j) step of batch-hard triplet mining."""
    j = pl.program_id(1)

    # Init lane-wide running accumulators at the first column tile.
    @pl.when(j == 0)
    def _():
        ap2_sc[...] = jnp.full(ap2_sc.shape, -jnp.inf, dtype=jnp.float32)
        an2_sc[...] = jnp.full(an2_sc.shape, jnp.inf, dtype=jnp.float32)

    xr = xr_ref[...]                                   # (TM, Dp)
    xc = xc_ref[...]                                   # (TN, Dp)
    # bf16 inputs (default) -> native single-pass MXU; only an explicit
    # gram_dtype=float32 request pays for the multi-pass f32 emulation.
    prec = jax.lax.Precision.HIGHEST if xr.dtype == jnp.float32 else None
    gram = jax.lax.dot_general(xr, xc, (((1,), (1,)), ((), ())),
                               preferred_element_type=jnp.float32,
                               precision=prec)         # (TM, TN) f32

    # Half squared distances (the 2x is folded into the wrapper-scaled norms
    # and re-applied once at finalize -> one fewer (TM,TN) multiply per tile).
    d2h = nrh_ref[...] + nch_ref[...] - gram           # (TM,1)+(1,TN)-(TM,TN)

    # Padded columns have label -1 and a huge finite half-norm, so a single
    # label compare replaces the old validity-mask stream.
    eq = labr_ref[...] == labc_ref[...]                # (TM, TN) bool
    pos = jnp.where(eq, d2h, -jnp.inf)
    neg = jnp.where(eq, jnp.inf, d2h)

    # Fold TN columns into 128 lanes with cheap VPU max/min on static,
    # lane-aligned slices; the XLU cross-lane reduce is deferred to finalize.
    ap = ap2_sc[...]
    an = an2_sc[...]
    for c in range(tn // 128):
        sl = slice(c * 128, (c + 1) * 128)
        ap = jnp.maximum(ap, pos[:, sl])
        an = jnp.minimum(an, neg[:, sl])
    ap2_sc[...] = ap
    an2_sc[...] = an

    # Finalize at the last column tile: one cross-lane reduce per row tile,
    # sqrt (with the eps clamp, preserving PyTorch clamp-then-sqrt semantics
    # since both are monotone) only on the two mined (TM,) vectors, then the
    # MarginRankingLoss hinge, stored lane-dense.
    @pl.when(j == pl.num_programs(1) - 1)
    def _():
        ap_t = jnp.transpose(ap2_sc[...])              # (128, TM) via XLU
        an_t = jnp.transpose(an2_sc[...])
        d2_ap = 2.0 * jnp.max(ap_t, axis=0)            # (TM,) lane-major
        d2_an = 2.0 * jnp.min(an_t, axis=0)
        d_ap = jnp.sqrt(jnp.maximum(d2_ap, eps))
        d_an = jnp.sqrt(jnp.maximum(d2_an, eps))
        hinge = jnp.maximum(d_ap - d_an + margin, 0.0)
        hinge_ref[...] = hinge.reshape(hinge_ref.shape)


def _round_up(x, m):
    return ((x + m - 1) // m) * m


def _has_big_vmem():
    # v5e / v6e have 128 MiB VMEM; v7x has 64 MiB.  Unknown -> conservative.
    try:
        kind = jax.devices()[0].device_kind.lower()
    except Exception:
        return False
    return ("v5" in kind) or ("v6" in kind)


def batch_hard_loss(features, labels, margin=1.0, eps=1e-6,
                    gram_dtype=jnp.bfloat16):
    """features: (N, D) float, labels: (N,) int -> scalar f32 loss.

    gram_dtype=None keeps the gram matmul in the input dtype (f32 uses
    Precision.HIGHEST to reproduce torch.float32 matmul semantics exactly).
    """
    if margin is None:
        # TODO(synk): margin=None (nn.SoftMarginLoss) branch not implemented.
        raise NotImplementedError("SoftMarginLoss branch (margin=None)")
    N, D = features.shape
    big_vmem = _has_big_vmem()

    # Tile selection: 128-row tiles for small N (two row tiles for N in
    # (128,256] keep both v7x TensorCores busy via the parallel row axis);
    # 256x256 otherwise, 256x512 on big-VMEM chips for large N.
    if N <= 128:
        tm, tn = 128, 128
    elif N <= 256:
        tm, tn = 128, 256
    else:
        tm = 256
        tn = 512 if (big_vmem and N >= 1024) else 256
    n_pad = _round_up(N, max(tm, tn))
    pad = n_pad - N
    d_pad = _round_up(D, 128)          # lane-aligned feature / MXU-K dim

    feats_f32 = features.astype(jnp.float32)
    half_norms = 0.5 * jnp.sum(feats_f32 * feats_f32, axis=1)        # (N,) f32
    nrh = jnp.pad(half_norms, (0, pad)).reshape(n_pad, 1)
    nch = jnp.pad(half_norms, (0, pad),
                  constant_values=_PAD_SENTINEL).reshape(1, n_pad)

    feat_p = jnp.pad(features, ((0, pad), (0, d_pad - D)))
    if gram_dtype is not None:
        feat_p = feat_p.astype(gram_dtype)            # bf16 gram by default

    lab = jnp.pad(labels.astype(jnp.int32), (0, pad), constant_values=-1)
    lab_col = lab.reshape(n_pad, 1)
    lab_row = lab.reshape(1, n_pad)

    kernel = functools.partial(_batch_hard_kernel, margin=float(margin),
                               eps=float(eps), tn=tn)

    itemsize = jnp.dtype(feat_p.dtype).itemsize
    feat_block_bytes = 2 * (tm + tn) * d_pad * itemsize  # double-buffered
    vmem_limit = max(64 * 1024 * 1024 if big_vmem else 32 * 1024 * 1024,
                     feat_block_bytes + 8 * 1024 * 1024)
    # TODO(synk): for very large D (>~8K) on v7x (64 MiB VMEM) add a D-tiling
    # grid axis with an f32 gram accumulator instead of full (., D) blocks.

    n_row_tiles = n_pad // tm
    hinge = pl.pallas_call(
        kernel,
        out_shape=jax.ShapeDtypeStruct((n_row_tiles, 1, tm), jnp.float32),
        grid_spec=pltpu.PrefetchScalarGridSpec(
            num_scalar_prefetch=0,
            grid=(n_row_tiles, n_pad // tn),
            in_specs=[
                pl.BlockSpec((tm, d_pad), lambda i, j: (i, 0)),   # query rows
                pl.BlockSpec((tn, d_pad), lambda i, j: (j, 0)),   # key rows
                pl.BlockSpec((tm, 1), lambda i, j: (i, 0)),       # 0.5|x|^2 row
                pl.BlockSpec((1, tn), lambda i, j: (0, j)),       # 0.5|x|^2 col
                pl.BlockSpec((tm, 1), lambda i, j: (i, 0)),       # row labels
                pl.BlockSpec((1, tn), lambda i, j: (0, j)),       # col labels
            ],
            out_specs=pl.BlockSpec((1, 1, tm), lambda i, j: (i, 0, 0)),
            scratch_shapes=[
                pltpu.VMEM((tm, 128), jnp.float32),   # running max pos d^2/2
                pltpu.VMEM((tm, 128), jnp.float32),   # running min neg d^2/2
            ],
        ),
        compiler_params=pltpu.CompilerParams(
            dimension_semantics=("parallel", "arbitrary"),
            vmem_limit_bytes=int(vmem_limit),
        ),
    )(feat_p, feat_p, nrh, nch, lab_col, lab_row)

    # True-N mean: padded rows sliced off before the reduction.
    return jnp.mean(hinge.reshape(-1)[:N])


def _reference_loss(features, labels, margin=1.0, eps=1e-6, gram_dtype=None):
    """Pure-JAX reference with the PyTorch module's semantics.  Optionally
    matches the kernel's bf16 gram (f32 accumulate) for tight comparison."""
    x = features.astype(jnp.float32)
    x2 = jnp.sum(x * x, axis=1, keepdims=True)
    if gram_dtype is not None:
        xm = features.astype(gram_dtype)
        gram = jnp.matmul(xm, xm.T, preferred_element_type=jnp.float32)
    else:
        gram = jnp.matmul(x, x.T, precision=jax.lax.Precision.HIGHEST)
    d2 = jnp.maximum(x2 + x2.T - 2.0 * gram, eps)
    d = jnp.sqrt(d2)
    is_pos = labels[:, None] == labels[None, :]
    ap = jnp.max(jnp.where(is_pos, d, -jnp.inf), axis=1)
    an = jnp.min(jnp.where(is_pos, jnp.inf, d), axis=1)
    return jnp.mean(jnp.maximum(ap - an + margin, 0.0))


if __name__ == "__main__":
    key = jax.random.PRNGKey(0)

    # Small demo consistent with the module's forward: (N, D) features + labels.
    N, D = 8, 32
    features = jax.random.normal(key, (N, D), dtype=jnp.float32)
    labels = jnp.array([0, 0, 1, 1, 2, 2, 3, 3], dtype=jnp.int32)

    loss = batch_hard_loss(features, labels)          # default bf16 gram
    jax.block_until_ready(loss)
    ref_m = _reference_loss(features, labels, gram_dtype=jnp.bfloat16)
    ref_f = _reference_loss(features, labels)
    assert jnp.allclose(loss, ref_m, rtol=2e-3, atol=2e-3), (loss, ref_m)
    assert jnp.allclose(loss, ref_f, rtol=5e-2, atol=5e-2), (loss, ref_f)

    # Tiled / padded path: grid=(2,2), N padded 300 -> 512, D padded 64 -> 128.
    k2, k3 = jax.random.split(key)
    N2, D2 = 300, 64
    feats2 = jax.random.normal(k2, (N2, D2), dtype=jnp.float32)
    labels2 = jnp.arange(N2, dtype=jnp.int32) % 5
    loss2 = batch_hard_loss(feats2, labels2)
    jax.block_until_ready(loss2)
    ref2_m = _reference_loss(feats2, labels2, gram_dtype=jnp.bfloat16)
    ref2_f = _reference_loss(feats2, labels2)
    assert jnp.allclose(loss2, ref2_m, rtol=2e-3, atol=2e-3), (loss2, ref2_m)
    assert jnp.allclose(loss2, ref2_f, rtol=5e-2, atol=5e-2), (loss2, ref2_f)

    # Exact-f32 gram path (Precision.HIGHEST) must match the f32 reference.
    loss2_f32 = batch_hard_loss(feats2, labels2, gram_dtype=None)
    jax.block_until_ready(loss2_f32)
    assert jnp.allclose(loss2_f32, ref2_f, rtol=1e-4, atol=1e-4), (loss2_f32,
                                                                   ref2_f)

    # 128 < N <= 256 branch: tm=128, tn=256, grid=(2,1); D padded 160 -> 256.
    N3, D3 = 200, 160
    feats3 = jax.random.normal(k3, (N3, D3), dtype=jnp.float32)
    labels3 = jnp.arange(N3, dtype=jnp.int32) % 7
    loss3 = batch_hard_loss(feats3, labels3)
    jax.block_until_ready(loss3)
    ref3_m = _reference_loss(feats3, labels3, gram_dtype=jnp.bfloat16)
    assert jnp.allclose(loss3, ref3_m, rtol=2e-3, atol=2e-3), (loss3, ref3_m)

    print("KERNEL_OK")
</pallas_src>

<mosaic_0001>
module attributes {stable_mosaic.version = 11 : i64} {
  func.func @_batch_hard_kernel(%arg0: i32, %arg1: i32, %arg2: memref<128x128xbf16, #tpu.memory_space<vmem>>, %arg3: memref<128x128xbf16, #tpu.memory_space<vmem>>, %arg4: memref<128x1xf32, #tpu.memory_space<vmem>>, %arg5: memref<1x128xf32, #tpu.memory_space<vmem>>, %arg6: memref<128x1xi32, #tpu.memory_space<vmem>>, %arg7: memref<1x128xi32, #tpu.memory_space<vmem>>, %arg8: memref<1x1x128xf32, #tpu.memory_space<vmem>>, %arg9: memref<128x128xf32, #tpu.memory_space<vmem>>, %arg10: memref<128x128xf32, #tpu.memory_space<vmem>>) attributes {dimension_semantics = [#tpu.dimension_semantics<parallel>, #tpu.dimension_semantics<arbitrary>], iteration_bounds = array<i64: 1, 1>, scalar_prefetch = 0 : i64, scratch_operands = 2 : i64, tpu.core_type = #tpu.core_type<tc>, window_params = [{transform_indices = @transform_0, window_bounds = array<i64: 128, 128>}, {transform_indices = @transform_1, window_bounds = array<i64: 128, 128>}, {transform_indices = @transform_2, window_bounds = array<i64: 128, 1>}, {transform_indices = @transform_3, window_bounds = array<i64: 1, 128>}, {transform_indices = @transform_4, window_bounds = array<i64: 128, 1>}, {transform_indices = @transform_5, window_bounds = array<i64: 1, 128>}, {transform_indices = @transform_6, window_bounds = array<i64: 1, 1, 128>}]} {
    %c0_i32 = arith.constant 0 : i32
    %0 = arith.cmpi eq, %arg1, %c0_i32 : i32
    %1 = arith.extui %0 : i1 to i32
    %c0_i32_0 = arith.constant 0 : i32
    %2 = arith.cmpi ne, %1, %c0_i32_0 : i32
    scf.if %2 {
      %cst_24 = arith.constant 0xFF800000 : f32
      %30 = vector.broadcast %cst_24 : f32 to vector<128x128xf32>
      %c0_25 = arith.constant 0 : index
      %c0_26 = arith.constant 0 : index
      %31 = vector.load %arg9[%c0_25, %c0_26] : memref<128x128xf32, #tpu.memory_space<vmem>>, vector<128x128xf32>
      tpu.vector_store %arg9[%c0_25, %c0_26], %30 {strides = array<i32>} : memref<128x128xf32, #tpu.memory_space<vmem>>, vector<128x128xf32>,
      %cst_27 = arith.constant 0x7F800000 : f32
      %32 = vector.broadcast %cst_27 : f32 to vector<128x128xf32>
      %c0_28 = arith.constant 0 : index
      %c0_29 = arith.constant 0 : index
      %33 = vector.load %arg10[%c0_28, %c0_29] : memref<128x128xf32, #tpu.memory_space<vmem>>, vector<128x128xf32>
      tpu.vector_store %arg10[%c0_28, %c0_29], %32 {strides = array<i32>} : memref<128x128xf32, #tpu.memory_space<vmem>>, vector<128x128xf32>,
    } else {
    }
    %c0 = arith.constant 0 : index
    %c0_1 = arith.constant 0 : index
    %3 = vector.load %arg2[%c0, %c0_1] : memref<128x128xbf16, #tpu.memory_space<vmem>>, vector<128x128xbf16>
    %c0_2 = arith.constant 0 : index
    %c0_3 = arith.constant 0 : index
    %4 = vector.load %arg3[%c0_2, %c0_3] : memref<128x128xbf16, #tpu.memory_space<vmem>>, vector<128x128xbf16>
    %cst = arith.constant dense<0.000000e+00> : vector<128x128xf32>
    %5 = tpu.matmul %3, %4, %cst {dimension_numbers = #tpu.dot_dimension_numbers<[1], [1], [0], [0], [0, 0, 1, 0], [], []>} : vector<128x128xbf16>, vector<128x128xbf16>, vector<128x128xf32> -> vector<128x128xf32>
    %c0_4 = arith.constant 0 : index
    %c0_5 = arith.constant 0 : index
    %6 = vector.load %arg4[%c0_4, %c0_5] : memref<128x1xf32, #tpu.memory_space<vmem>>, vector<128x1xf32>
    %c0_6 = arith.constant 0 : index
    %c0_7 = arith.constant 0 : index
    %7 = vector.load %arg5[%c0_6, %c0_7] : memref<1x128xf32, #tpu.memory_space<vmem>>, vector<1x128xf32>
    %8 = vector.broadcast %6 : vector<128x1xf32> to vector<128x128xf32>
    %9 = vector.broadcast %7 : vector<1x128xf32> to vector<128x128xf32>
    %10 = arith.addf %8, %9 : vector<128x128xf32>
    %11 = arith.subf %10, %5 : vector<128x128xf32>
    %c0_8 = arith.constant 0 : index
    %c0_9 = arith.constant 0 : index
    %12 = vector.load %arg6[%c0_8, %c0_9] : memref<128x1xi32, #tpu.memory_space<vmem>>, vector<128x1xi32>
    %c0_10 = arith.constant 0 : index
    %c0_11 = arith.constant 0 : index
    %13 = vector.load %arg7[%c0_10, %c0_11] : memref<1x128xi32, #tpu.memory_space<vmem>>, vector<1x128xi32>
    %14 = vector.broadcast %12 : vector<128x1xi32> to vector<128x128xi32>
    %15 = vector.broadcast %13 : vector<1x128xi32> to vector<128x128xi32>
    %16 = arith.cmpi eq, %14, %15 : vector<128x128xi32>
    %cst_12 = arith.constant 0xFF800000 : f32
    %17 = vector.broadcast %cst_12 : f32 to vector<128x128xf32>
    %18 = arith.select %16, %11, %17 : vector<128x128xi1>, vector<128x128xf32>
    %cst_13 = arith.constant 0x7F800000 : f32
    %19 = vector.broadcast %cst_13 : f32 to vector<128x128xf32>
    %20 = arith.select %16, %19, %11 : vector<128x128xi1>, vector<128x128xf32>
    %c0_14 = arith.constant 0 : index
    %c0_15 = arith.constant 0 : index
    %21 = vector.load %arg9[%c0_14, %c0_15] : memref<128x128xf32, #tpu.memory_space<vmem>>, vector<128x128xf32>
    %c0_16 = arith.constant 0 : index
    %c0_17 = arith.constant 0 : index
    %22 = vector.load %arg10[%c0_16, %c0_17] : memref<128x128xf32, #tpu.memory_space<vmem>>, vector<128x128xf32>
    %23 = arith.maximumf %21, %18 : vector<128x128xf32>
    %24 = arith.minimumf %22, %20 : vector<128x128xf32>
    %c0_18 = arith.constant 0 : index
    %c0_19 = arith.constant 0 : index
    %25 = vector.load %arg9[%c0_18, %c0_19] : memref<128x128xf32, #tpu.memory_space<vmem>>, vector<128x128xf32>
    tpu.vector_store %arg9[%c0_18, %c0_19], %23 {strides = array<i32>} : memref<128x128xf32, #tpu.memory_space<vmem>>, vector<128x128xf32>,
    %c0_20 = arith.constant 0 : index
    %c0_21 = arith.constant 0 : index
    %26 = vector.load %arg10[%c0_20, %c0_21] : memref<128x128xf32, #tpu.memory_space<vmem>>, vector<128x128xf32>
    tpu.vector_store %arg10[%c0_20, %c0_21], %24 {strides = array<i32>} : memref<128x128xf32, #tpu.memory_space<vmem>>, vector<128x128xf32>,
    %c0_i32_22 = arith.constant 0 : i32
    %27 = arith.cmpi eq, %arg1, %c0_i32_22 : i32
    %28 = arith.extui %27 : i1 to i32
    %c0_i32_23 = arith.constant 0 : i32
    %29 = arith.cmpi ne, %28, %c0_i32_23 : i32
    scf.if %29 {
      %c0_24 = arith.constant 0 : index
      %c0_25 = arith.constant 0 : index
      %30 = vector.load %arg9[%c0_24, %c0_25] : memref<128x128xf32, #tpu.memory_space<vmem>>, vector<128x128xf32>
      %31 = tpu.transpose %30, [1, 0] : vector<128x128xf32> -> vector<128x128xf32>
      %c0_26 = arith.constant 0 : index
      %c0_27 = arith.constant 0 : index
      %32 = vector.load %arg10[%c0_26, %c0_27] : memref<128x128xf32, #tpu.memory_space<vmem>>, vector<128x128xf32>
      %33 = tpu.transpose %32, [1, 0] : vector<128x128xf32> -> vector<128x128xf32>
      %cst_28 = arith.constant dense<0xFF800000> : vector<128xf32>
      %34 = vector.multi_reduction <maximumf>, %31, %cst_28 [0] : vector<128x128xf32> to vector<128xf32>
      %cst_29 = arith.constant 2.000000e+00 : f32
      %35 = vector.broadcast %cst_29 : f32 to vector<128xf32>
      %36 = arith.mulf %35, %34 : vector<128xf32>
      %cst_30 = arith.constant dense<0x7F800000> : vector<128xf32>
      %37 = vector.multi_reduction <minimumf>, %33, %cst_30 [0] : vector<128x128xf32> to vector<128xf32>
      %cst_31 = arith.constant 2.000000e+00 : f32
      %38 = vector.broadcast %cst_31 : f32 to vector<128xf32>
      %39 = arith.mulf %38, %37 : vector<128xf32>
      %cst_32 = arith.constant 9.99999997E-7 : f32
      %40 = vector.broadcast %cst_32 : f32 to vector<128xf32>
      %41 = arith.maximumf %36, %40 : vector<128xf32>
      %42 = math.sqrt %41 : vector<128xf32>
      %cst_33 = arith.constant 9.99999997E-7 : f32
      %43 = vector.broadcast %cst_33 : f32 to vector<128xf32>
      %44 = arith.maximumf %39, %43 : vector<128xf32>
      %45 = math.sqrt %44 : vector<128xf32>
      %46 = arith.subf %42, %45 : vector<128xf32>
      %cst_34 = arith.constant 1.000000e+00 : f32
      %47 = vector.broadcast %cst_34 : f32 to vector<128xf32>
      %48 = arith.addf %46, %47 : vector<128xf32>
      %cst_35 = arith.constant 0.000000e+00 : f32
      %49 = vector.broadcast %cst_35 : f32 to vector<128xf32>
      %50 = arith.maximumf %48, %49 : vector<128xf32>
      %51 = vector.shape_cast %50 : vector<128xf32> to vector<1x1x128xf32>
      %c0_36 = arith.constant 0 : index
      %c0_37 = arith.constant 0 : index
      %c0_38 = arith.constant 0 : index
      %52 = vector.load %arg8[%c0_36, %c0_37, %c0_38] : memref<1x1x128xf32, #tpu.memory_space<vmem>>, vector<1x1x128xf32>
      tpu.vector_store %arg8[%c0_36, %c0_37, %c0_38], %51 {strides = array<i32>} : memref<1x1x128xf32, #tpu.memory_space<vmem>>, vector<1x1x128xf32>,
    } else {
    }
    return
  }
  func.func @transform_0(%arg0: i32, %arg1: i32) -> (i32, i32) {
    %c0_i32 = arith.constant 0 : i32
    %c0_i32_0 = arith.constant 0 : i32
    return %arg0, %c0_i32 : i32, i32
  }
  func.func @transform_1(%arg0: i32, %arg1: i32) -> (i32, i32) {
    %c0_i32 = arith.constant 0 : i32
    %c0_i32_0 = arith.constant 0 : i32
    return %arg1, %c0_i32 : i32, i32
  }
  func.func @transform_2(%arg0: i32, %arg1: i32) -> (i32, i32) {
    %c0_i32 = arith.constant 0 : i32
    %c0_i32_0 = arith.constant 0 : i32
    return %arg0, %c0_i32 : i32, i32
  }
  func.func @transform_3(%arg0: i32, %arg1: i32) -> (i32, i32) {
    %c0_i32 = arith.constant 0 : i32
    %c0_i32_0 = arith.constant 0 : i32
    return %c0_i32, %arg1 : i32, i32
  }
  func.func @transform_4(%arg0: i32, %arg1: i32) -> (i32, i32) {
    %c0_i32 = arith.constant 0 : i32
    %c0_i32_0 = arith.constant 0 : i32
    return %arg0, %c0_i32 : i32, i32
  }
  func.func @transform_5(%arg0: i32, %arg1: i32) -> (i32, i32) {
    %c0_i32 = arith.constant 0 : i32
    %c0_i32_0 = arith.constant 0 : i32
    return %c0_i32, %arg1 : i32, i32
  }
  func.func @transform_6(%arg0: i32, %arg1: i32) -> (i32, i32, i32) {
    %c0_i32 = arith.constant 0 : i32
    %c0_i32_0 = arith.constant 0 : i32
    %c0_i32_1 = arith.constant 0 : i32
    return %arg0, %c0_i32, %c0_i32_0 : i32, i32, i32
  }
}

</mosaic_0001>

<bundles_post_ra>
// kernel: tpu_custom_call.1
= control target key start
LH: loop header
LB: loop body
LE: loop exit
PB: predicated region body
PF: predicated region fallthrough
CT: control target
= control target key end

     0   :  { %v941_v2 = vmov 0   ;;  %s1203_s0 = inlined_call_operand.vmem [shape: bf16[128,128], index: 0, kind: input, shape index: {}]   ;;  %s1204_s1 = inlined_call_operand.vmem [shape: bf16[128,128], index: 1, kind: input, shape index: {}]   ;;  %s1205_s2 = inlined_call_operand.vmem [shape: f32[128,1], index: 2, kind: input, shape index: {}]   ;;  %s1206_s3 = inlined_call_operand.vmem [shape: f32[1,128], index: 3, kind: input, shape index: {}]   ;;  %s1207_s4 = inlined_call_operand.vmem [shape: s32[128,1], index: 4, kind: input, shape index: {}]   ;;  %s1208_s5 = inlined_call_operand.vmem [shape: s32[1,128], index: 5, kind: input, shape index: {}]   ;;  %s1209_s6 = inlined_call_operand.hbm [shape: f32[1,1,128], index: 6, kind: output, shape index: {}]  }
   0x1   :  { %v897_v0 = vld [vmem:[%s1204_s1] sm:$0xff]   ;;  %v898_v1 = vld [vmem:[%s1204_s1 + $0x8] sm:$0xff]   ;;  %895 = vset.pattern.permute.xlu0 %v941_v2  ;;  %896 = vset.pattern.permute.xlu1 %v941_v2  ;;  %v899_v3 = vld [vmem:[%s1204_s1 + $0x10] sm:$0xff]  }
   0x2   :  { %845 = vmatprep.subr.bf16.mxu0 %v897_v0  ;;  %877 = vmatprep.subr.bf16.mxu1 %v897_v0  ;;  %v905_v4 = vld [vmem:[%s1203_s0] sm:$0xff]   ;;  %v900_v6 = vld [vmem:[%s1204_s1 + $0x18] sm:$0xff]   ;;  %v287_v9 = vld [vmem:[%s1205_s2 + $0x8] sm:$0xff] }
   0x3   :  { %846 = vmatpush3.bf16.xpose.msra.mxu0 %v897_v0  ;;  %885 = vmatpush3.bf16.xpose.msra.mxu1 %v897_v0  ;;  %v906_v5 = vld [vmem:[%s1203_s0 + $0x20] sm:$0xff]   ;;  %v288_v10 = vld [vmem:[%s1205_s2 + $0x10] sm:$0xff]  ;;  %v422_v11 = vld [vmem:[%s1207_s4 + $0x8] sm:$0xff] }
   0x4   :  { %847 = vmatprep.subr.bf16.mxu0 %v898_v1  ;;  %878 = vmatprep.subr.bf16.mxu1 %v898_v1  ;;  %v286_v7 = vld [vmem:[%s1205_s2] sm:$0xff]  ;;  %v289_v12 = vld [vmem:[%s1205_s2 + $0x18] sm:$0xff]  ;;  %v423_v14 = vld [vmem:[%s1207_s4 + $0x10] sm:$0xff] }
   0x5   :  { %861 = vmatprep.mubr.bf16.mxu0 %v905_v4  ;;  %869 = vmatprep.mubr.bf16.mxu1 %v906_v5  ;;  %v421_v8 = vld [vmem:[%s1207_s4] sm:$0xff] }
   0x6   :  { %305 = vperm.xlu0 %895, %v286_v7   ;;  %439 = vperm.xlu1 %896, %v421_v8   ;;  %v901_v13 = vld [vmem:[%s1204_s1 + $0x20] sm:$0xff]  }
   0x7   :  { %v290_v15 = vld [vmem:[%s1205_s2 + $0x20] sm:$0xff] }
   0xa   :  { %310 = vperm.xlu0 %895, %v287_v9   ;;  %315 = vperm.xlu1 %896, %v288_v10  }
   0xb   :  { %848 = vmatpush3.bf16.xpose.msra.mxu0 %v898_v1  ;;  %886 = vmatpush3.bf16.xpose.msra.mxu1 %v898_v1 }
   0xc   :  { %849 = vmatprep.subr.bf16.mxu0 %v899_v3  ;;  %879 = vmatprep.subr.bf16.mxu1 %v899_v3 }
   0xe   :  { %442 = vperm.xlu0 %895, %v422_v11   ;;  %320 = vperm.xlu1 %896, %v289_v12  }
  0x13   :  { %850 = vmatpush3.bf16.xpose.msra.mxu0 %v899_v3  ;;  %887 = vmatpush3.bf16.xpose.msra.mxu1 %v899_v3 }
  0x14   :  { %851 = vmatprep.subr.bf16.mxu0 %v900_v6  ;;  %880 = vmatprep.subr.bf16.mxu1 %v900_v6 }
  0x1b   :  { %852 = vmatpush3.bf16.xpose.msra.mxu0 %v900_v6  ;;  %888 = vmatpush3.bf16.xpose.msra.mxu1 %v900_v6 }
  0x1c   :  { %11 = vsyncpa [#allocation5], 0  ;;  %853 = vmatprep.subr.bf16.mxu0 %v901_v13  ;;  %881 = vmatprep.subr.bf16.mxu1 %v901_v13  ;;  %v424_v16 = vld [vmem:[%s1207_s4 + $0x18] sm:$0xff]  ;;  %v291_v17 = vld [vmem:[%s1205_s2 + $0x28] sm:$0xff] }
  0x1d   :  { %445 = vperm.xlu0 %895, %v423_v14   ;;  %325 = vperm.xlu1 %896, %v290_v15   ;;  %v902_v18 = vld [vmem:[%s1204_s1 + $0x28] sm:$0xff]   ;;  %v425_v19 = vld [vmem:[%s1207_s4 + $0x20] sm:$0xff]  ;;  %v292_v20 = vld [vmem:[%s1205_s2 + $0x30] sm:$0xff] }
  0x1e   :  { %v426_v21 = vld [vmem:[%s1207_s4 + $0x28] sm:$0xff]  ;;  %v293_v22 = vld [vmem:[%s1205_s2 + $0x38] sm:$0xff]  ;;  %v903_v23 = vld [vmem:[%s1204_s1 + $0x30] sm:$0xff]  }
  0x1f   :  { %v427_v24 = vld [vmem:[%s1207_s4 + $0x30] sm:$0xff]  ;;  %v294_v25 = vld [vmem:[%s1205_s2 + $0x40] sm:$0xff]  ;;  %v428_v26 = vld [vmem:[%s1207_s4 + $0x38] sm:$0xff] }
  0x20   :  { %v295_v27 = vld [vmem:[%s1205_s2 + $0x48] sm:$0xff]  ;;  %v904_v28 = vld [vmem:[%s1204_s1 + $0x38] sm:$0xff]   ;;  %v429_v29 = vld [vmem:[%s1207_s4 + $0x40] sm:$0xff] }
  0x21   :  { %448 = vperm.xlu0 %895, %v424_v16   ;;  %330 = vperm.xlu1 %896, %v291_v17   ;;  %v296_v30 = vld [vmem:[%s1205_s2 + $0x50] sm:$0xff]  ;;  %v430_v31 = vld [vmem:[%s1207_s4 + $0x48] sm:$0xff]  ;;  %v297_v32 = vld [vmem:[%s1205_s2 + $0x58] sm:$0xff] }
  0x22   :  { %v431_v33 = vld [vmem:[%s1207_s4 + $0x50] sm:$0xff]  ;;  %v298_v34 = vld [vmem:[%s1205_s2 + $0x60] sm:$0xff]  ;;  %v907_v35 = vld [vmem:[%s1203_s0 + $0x8] sm:$0xff]  }
  0x23   :  { %854 = vmatpush3.bf16.xpose.msra.mxu0 %v901_v13  ;;  %889 = vmatpush3.bf16.xpose.msra.mxu1 %v901_v13  ;;  %v908_v36 = vld [vmem:[%s1203_s0 + $0x28] sm:$0xff]   ;;  %v432_v37 = vld [vmem:[%s1207_s4 + $0x58] sm:$0xff]  ;;  %v909_v39 = vld [vmem:[%s1203_s0 + $0x10] sm:$0xff]  }
  0x24   :  { %855 = vmatprep.subr.bf16.mxu0 %v902_v18  ;;  %882 = vmatprep.subr.bf16.mxu1 %v902_v18  ;;  %v299_v38 = vld [vmem:[%s1205_s2 + $0x68] sm:$0xff]  ;;  %v910_v40 = vld [vmem:[%s1203_s0 + $0x30] sm:$0xff]   ;;  %v433_v41 = vld [vmem:[%s1207_s4 + $0x60] sm:$0xff] }
  0x25   :  { %451 = vperm.xlu0 %895, %v425_v19   ;;  %335 = vperm.xlu1 %896, %v292_v20   ;;  %v300_v42 = vld [vmem:[%s1205_s2 + $0x70] sm:$0xff]  ;;  %v911_v43 = vld [vmem:[%s1203_s0 + $0x18] sm:$0xff]   ;;  %v434_v45 = vld [vmem:[%s1207_s4 + $0x68] sm:$0xff] }
  0x26   :  { %v912_v44 = vld [vmem:[%s1203_s0 + $0x38] sm:$0xff]   ;;  %v435_v47 = vld [vmem:[%s1207_s4 + $0x70] sm:$0xff]  ;;  %v1125_v60 = vld [vmem:[%s1206_s3] ss:$0 sm:$0xff]  ;;  %s942_s3 = smov [#allocation4]  }
  0x27   :  { %v301_v46 = vld [vmem:[%s1205_s2 + $0x78] sm:$0xff]  ;;  %v1135_v2 = vld [vmem:[%s1208_s5] ss:$0 sm:$0xff]  ;;  %s803_s5 = sshll.u32 %s942_s3, 4  ;;  %s804_s5 = int_to_ptr.vmem [resolvable:$true] %s803_s5 }
  0x28   :  { %v436_v48 = vld [vmem:[%s1207_s4 + $0x78] sm:$0xff]  ;;  %s917_s20 = scalar_lea.vmem %s804_s5, 16  ;;  %s921_s21 = scalar_lea.vmem %s804_s5, 32 }
  0x29   :  { %454 = vperm.xlu0 %895, %v426_v21   ;;  %340 = vperm.xlu1 %896, %v293_v22   ;;  %p918_p0 = scmp.ne.s32.totalorder %s804_s5, %s917_s20  ;;  %p922_p1 = scmp.lt.s32.totalorder %s804_s5, %s804_s5 }
  0x2a   :  { %p923_p2 = scmp.lt.s32.totalorder %s921_s21, %s917_s20 }
  0x2b   :  { %856 = vmatpush3.bf16.xpose.msra.mxu0 %v902_v18  ;;  %890 = vmatpush3.bf16.xpose.msra.mxu1 %v902_v18 }
  0x2c   :  { %857 = vmatprep.subr.bf16.mxu0 %v903_v23  ;;  %883 = vmatprep.subr.bf16.mxu1 %v903_v23  ;;  %p924_p3 = por %p923_p2, %p922_p1 }
  0x2d   :  { %457 = vperm.xlu0 %895, %v427_v24   ;;  %345 = vperm.xlu1 %896, %v294_v25  }
  0x2e   :  { %p925_p4 = pnand %p924_p3, %p918_p0 }
  0x31   :  { %460 = vperm.xlu0 %895, %v428_v26   ;;  %350 = vperm.xlu1 %896, %v295_v27  }
  0x33   :  { %858 = vmatpush3.bf16.xpose.msra.mxu0 %v903_v23  ;;  %891 = vmatpush3.bf16.xpose.msra.mxu1 %v903_v23 }
  0x34   :  { %859 = vmatprep.subr.bf16.mxu0 %v904_v28  ;;  %884 = vmatprep.subr.bf16.mxu1 %v904_v28 }
  0x35   :  { %463 = vperm.xlu0 %895, %v429_v29   ;;  %355 = vperm.xlu1 %896, %v296_v30  }
  0x39   :  { %466 = vperm.xlu0 %895, %v430_v31   ;;  %360 = vperm.xlu1 %896, %v297_v32  }
  0x3b   :  { %860 = vmatpush3.bf16.xpose.msra.mxu0 %v904_v28  ;;  %892 = vmatpush3.bf16.xpose.msra.mxu1 %v904_v28 }
  0x3d   :  { %469 = vperm.xlu0 %895, %v431_v33   ;;  %365 = vperm.xlu1 %896, %v298_v34  }
  0x41   :  { %472 = vperm.xlu0 %895, %v432_v37   ;;  %370 = vperm.xlu1 %896, %v299_v38  }
  0x42   :  { %862 = vmatmul.mubr.bf16.vlgmr.msra.gmra.mrb[0].mxu0 %v907_v35  ;;  %870 = vmatmul.mubr.bf16.vlgmr.msra.gmra.mrb[0].mxu1 %v908_v36 }
  0x43   :  { %865 = vmatprep.mubr.bf16.mxu0 %v909_v39  ;;  %873 = vmatprep.mubr.bf16.mxu1 %v910_v40 }
  0x45   :  { %475 = vperm.xlu0 %895, %v433_v41   ;;  %375 = vperm.xlu1 %896, %v300_v42  }
  0x49   :  { %478 = vperm.xlu0 %895, %v434_v45   ;;  %380 = vperm.xlu1 %896, %v301_v46  }
  0x4a   :  { %866 = vmatmul.mubr.bf16.gmra.mrb[4].mxu0 %v911_v43  ;;  %874 = vmatmul.mubr.bf16.gmra.mrb[4].mxu1 %v912_v44 }
  0x4d   :  { %481 = vperm.xlu0 %895, %v435_v47   ;;  %484 = vperm.xlu1 %896, %v436_v48  }
  0x85   :  { %v306_v49 = vpop.permute.xlu0 %305  ;;  %v440_v50 = vpop.permute.xlu1 %439 }
  0x86   :  { %v389_v61 = vadd.f32 %v1125_v60, %v306_v49  ;;  %vm490_vm0 = vcmp.eq.s32.totalorder %v440_v50, %v1135_v2 }
  0x89   :  { %v311_v51 = vpop.permute.xlu0 %310  ;;  %v316_v52 = vpop.permute.xlu1 %315 }
  0x8a   :  { %v390_v8 = vadd.f32 %v1125_v60, %v311_v51  ;;  %v391_v11 = vadd.f32 %v1125_v60, %v316_v52 }
  0x8d   :  { %v443_v53 = vpop.permute.xlu0 %442  ;;  %v321_v54 = vpop.permute.xlu1 %320 }
  0x8e   :  { %vm491_vm1 = vcmp.eq.s32.totalorder %v443_v53, %v1135_v2  ;;  %v392_v19 = vadd.f32 %v1125_v60, %v321_v54 }
  0x9c   :  { %v446_v55 = vpop.permute.xlu0 %445  ;;  %v326_v56 = vpop.permute.xlu1 %325 }
  0x9d   :  { %vm492_vm2 = vcmp.eq.s32.totalorder %v446_v55, %v1135_v2  ;;  %v393_v33 = vadd.f32 %v1125_v60, %v326_v56 }
  0xa0   :  { %v449_v57 = vpop.permute.xlu0 %448  ;;  %v331_v58 = vpop.permute.xlu1 %330 }
  0xa1   :  { %vm493_vm3 = vcmp.eq.s32.totalorder %v449_v57, %v1135_v2  ;;  %v394_v38 = vadd.f32 %v1125_v60, %v331_v58 }
  0xa4   :  { %v452_v59 = vpop.permute.xlu0 %451  ;;  %v336_v62 = vpop.permute.xlu1 %335 }
  0xa5   :  { %vm494_vm4 = vcmp.eq.s32.totalorder %v452_v59, %v1135_v2  ;;  %v395_v44 = vadd.f32 %v1125_v60, %v336_v62 }
  0xa8   :  { %v1128_v63 = vpop.permute.xlu0 %454  ;;  %v341_v15 = vpop.permute.xlu1 %340 }
  0xa9   :  { %vm495_vm5 = vcmp.eq.s32.totalorder %v1128_v63, %v1135_v2  ;;  %v396_v49 = vadd.f32 %v1125_v60, %v341_v15 }
  0xac   :  { %v458_v16 = vpop.permute.xlu0 %457  ;;  %v346_v29 = vpop.permute.xlu1 %345 }
  0xad   :  { %vm496_vm6 = vcmp.eq.s32.totalorder %v458_v16, %v1135_v2  ;;  %v397_v51 = vadd.f32 %v1125_v60, %v346_v29 }
  0xb0   :  { %v461_v34 = vpop.permute.xlu0 %460  ;;  %v351_v39 = vpop.permute.xlu1 %350 }
  0xb1   :  { %vm497_vm7 = vcmp.eq.s32.totalorder %v461_v34, %v1135_v2  ;;  %v398_v56 = vadd.f32 %v1125_v60, %v351_v39 }
  0xb4   :  { %v464_v40 = vpop.permute.xlu0 %463  ;;  %v356_v45 = vpop.permute.xlu1 %355 }
  0xb5   :  { %vm498_vm8 = vcmp.eq.s32.totalorder %v464_v40, %v1135_v2  ;;  %v399_v62 = vadd.f32 %v1125_v60, %v356_v45 }
  0xb8   :  { %v467_v50 = vpop.permute.xlu0 %466  ;;  %v361_v55 = vpop.permute.xlu1 %360 }
  0xb9   :  { %vm499_vm9 = vcmp.eq.s32.totalorder %v467_v50, %v1135_v2 }
  0xbc   :  { %v470_v57 = vpop.permute.xlu0 %469  ;;  %v366_v63 = vpop.permute.xlu1 %365 }
  0xbd   :  { %vm500_vm10 = vcmp.eq.s32.totalorder %v470_v57, %v1135_v2  ;;  %v401_v16 = vadd.f32 %v1125_v60, %v366_v63 }
 0x115   :  { %v863_v0 = vpop.f32.mrb[0].mxu0  ;;  %v1130_v1 = vpop.f32.mrb[0].mxu1 }
 0x116   :  { %v223_v3 = vpop.f32.mrb[1].mxu0  ;;  %v1137_v4 = vpop.f32.mrb[1].mxu1  ;;  %v407_v20 = vsub.f32 %v391_v11, %v863_v0 }
 0x117   :  { %v405_v5 = vsub.f32 %v389_v61, %v223_v3  ;;  %v864_v6 = vpop.f32.mrb[2].mxu0  ;;  %v1140_v7 = vpop.f32.mrb[2].mxu1  ;;  %v413_v58 = vsub.f32 %v397_v51, %v1137_v4  ;;  %v400_v4 = vadd.f32 %v1125_v60, %v361_v55 }
 0x118   :  { %v226_v9 = vpop.f32.mrb[3].mxu0  ;;  %v1143_v10 = vpop.f32.mrb[3].mxu1  ;;  %v508_v30 = vsel %vm492_vm2, %v407_v20, -inf  ;;  %v524_v31 = vsel %vm492_vm2, inf, %v407_v20  ;;  %v408_v32 = vsub.f32 %v392_v19, %v864_v6 }
 0x119   :  { %v406_v12 = vsub.f32 %v390_v8, %v226_v9  ;;  %v522_v13 = vsel %vm490_vm0, inf, %v405_v5  ;;  %v506_v14 = vsel %vm490_vm0, %v405_v5, -inf  ;;  %v514_v0 = vsel %vm498_vm8, %v413_v58, -inf  ;;  %v473_v6 = vpop.permute.xlu0 %472 }
 0x11a   :  { %701 = vxpose.xlu1.b32.start [1/16] %v522_v13, 128  ;;  %653 = vxpose.xlu0.b32.start [1/16] %v506_v14, 128  ;;  %v509_v35 = vsel %vm493_vm3, %v408_v32, -inf  ;;  %v525_v36 = vsel %vm493_vm3, inf, %v408_v32  ;;  %v530_v3 = vsel %vm498_vm8, inf, %v413_v58  ;;  %v414_v5 = vsub.f32 %v398_v56, %v1143_v10 }
 0x11b   :  { %v507_v21 = vsel %vm491_vm1, %v406_v12, -inf  ;;  %v523_v22 = vsel %vm491_vm1, inf, %v406_v12  ;;  %v415_v8 = vsub.f32 %v399_v62, %v1130_v1  ;;  %v371_v12 = vpop.permute.xlu1 %370  ;;  %v416_v10 = vsub.f32 %v400_v4, %v1140_v7 }
 0x11c   :  { %v515_v9 = vsel %vm499_vm9, %v414_v5, -inf  ;;  %v531_v11 = vsel %vm499_vm9, inf, %v414_v5  ;;  %vm501_vm11 = vcmp.eq.s32.totalorder %v473_v6, %v1135_v2 }
 0x11d   :  { %v867_v17 = vpop.f32.mrb[4].mxu0  ;;  %v1147_v18 = vpop.f32.mrb[4].mxu1  ;;  %v516_v14 = vsel %vm500_vm10, %v415_v8, -inf  ;;  %v532_v15 = vsel %vm500_vm10, inf, %v415_v8  ;;  %v517_v1 = vsel %vm501_vm11, %v416_v10, -inf  ;;  %v533_v19 = vsel %vm501_vm11, inf, %v416_v10 }
 0x11e   :  { %v1150_v23 = vpop.f32.mrb[5].mxu1  ;;  %v239_v24 = vpop.f32.mrb[5].mxu0  ;;  %702 = vxpose.xlu1.b32.cont [2/16] %v523_v22, 128  ;;  %654 = vxpose.xlu0.b32.cont [2/16] %v507_v21, 128  ;;  %v411_v46 = vsub.f32 %v395_v44, %v867_v17  ;;  %v402_v21 = vadd.f32 %v1125_v60, %v371_v12 }
 0x11f   :  { %v868_v25 = vpop.f32.mrb[6].mxu0  ;;  %v1152_v26 = vpop.f32.mrb[6].mxu1  ;;  %v409_v37 = vsub.f32 %v393_v33, %v239_v24  ;;  %v417_v20 = vsub.f32 %v401_v16, %v1150_v23 }
 0x120   :  { %v242_v27 = vpop.f32.mrb[7].mxu0  ;;  %v1154_v28 = vpop.f32.mrb[7].mxu1  ;;  %v512_v52 = vsel %vm496_vm6, %v411_v46, -inf  ;;  %v528_v53 = vsel %vm496_vm6, inf, %v411_v46  ;;  %v412_v54 = vsub.f32 %v396_v49, %v868_v25 }
 0x121   :  { %v510_v41 = vsel %vm494_vm4, %v409_v37, -inf  ;;  %v526_v42 = vsel %vm494_vm4, inf, %v409_v37  ;;  %v410_v43 = vsub.f32 %v394_v38, %v242_v27  ;;  %v476_v13 = vpop.permute.xlu0 %475  ;;  %v376_v17 = vpop.permute.xlu1 %375  ;;  %v418_v25 = vsub.f32 %v402_v21, %v1154_v28 }
 0x122   :  { %703 = vxpose.xlu1.b32.cont [3/16] %v524_v31, 128  ;;  %655 = vxpose.xlu0.b32.cont [3/16] %v508_v30, 128  ;;  %v513_v59 = vsel %vm497_vm7, %v412_v54, -inf  ;;  %v529_v61 = vsel %vm497_vm7, inf, %v412_v54  ;;  %vm502_vm12 = vcmp.eq.s32.totalorder %v476_v13, %v1135_v2  ;;  %v403_v27 = vadd.f32 %v1125_v60, %v376_v17 }
 0x123   :  { %v511_v47 = vsel %vm495_vm5, %v410_v43, -inf  ;;  %v527_v48 = vsel %vm495_vm5, inf, %v410_v43  ;;  %v518_v24 = vsel %vm502_vm12, %v417_v20, -inf  ;;  %v534_v7 = vsel %vm502_vm12, inf, %v417_v20 }
 0x124   :  { %v419_v23 = vsub.f32 %v403_v27, %v1147_v18 }
 0x125   :  { %v479_v22 = vpop.permute.xlu0 %478  ;;  %v381_v29 = vpop.permute.xlu1 %380 }
 0x126   :  { %704 = vxpose.xlu1.b32.cont [4/16] %v525_v36, 128  ;;  %656 = vxpose.xlu0.b32.cont [4/16] %v509_v35, 128  ;;  %vm503_vm13 = vcmp.eq.s32.totalorder %v479_v22, %v1135_v2  ;;  %v404_v33 = vadd.f32 %v1125_v60, %v381_v29 }
 0x127   :  { %v519_v31 = vsel %vm503_vm13, %v418_v25, -inf  ;;  %v535_v32 = vsel %vm503_vm13, inf, %v418_v25 }
 0x128   :  { %v420_v36 = vsub.f32 %v404_v33, %v1152_v26 }
 0x129   :  { %v482_v30 = vpop.permute.xlu0 %481  ;;  %v485_v34 = vpop.permute.xlu1 %484 }
 0x12a   :  { %705 = vxpose.xlu1.b32.cont [5/16] %v526_v42, 128  ;;  %657 = vxpose.xlu0.b32.cont [5/16] %v510_v41, 128  ;;  %vm504_vm14 = vcmp.eq.s32.totalorder %v482_v30, %v1135_v2  ;;  %vm505_vm15 = vcmp.eq.s32.totalorder %v485_v34, %v1135_v2 }
 0x12b   :  { %v520_v28 = vsel %vm504_vm14, %v419_v23, -inf  ;;  %v536_v35 = vsel %vm504_vm14, inf, %v419_v23  ;;  %v521_v37 = vsel %vm505_vm15, %v420_v36, -inf  ;;  %v537_v38 = vsel %vm505_vm15, inf, %v420_v36 }
 0x12e   :  { %706 = vxpose.xlu1.b32.cont [6/16] %v527_v48, 128  ;;  %658 = vxpose.xlu0.b32.cont [6/16] %v511_v47, 128 }
 0x132   :  { %707 = vxpose.xlu1.b32.cont [7/16] %v528_v53, 128  ;;  %659 = vxpose.xlu0.b32.cont [7/16] %v512_v52, 128 }
 0x136   :  { %708 = vxpose.xlu1.b32.cont [8/16] %v529_v61, 128  ;;  %660 = vxpose.xlu0.b32.cont [8/16] %v513_v59, 128 }
 0x13a   :  { %709 = vxpose.xlu1.b32.cont [9/16] %v530_v3, 128  ;;  %661 = vxpose.xlu0.b32.cont [9/16] %v514_v0, 128 }
 0x13e   :  { %710 = vxpose.xlu1.b32.cont [10/16] %v531_v11, 128  ;;  %662 = vxpose.xlu0.b32.cont [10/16] %v515_v9, 128 }
 0x142   :  { %711 = vxpose.xlu1.b32.cont [11/16] %v532_v15, 128  ;;  %663 = vxpose.xlu0.b32.cont [11/16] %v516_v14, 128 }
 0x146   :  { %712 = vxpose.xlu1.b32.cont [12/16] %v533_v19, 128  ;;  %664 = vxpose.xlu0.b32.cont [12/16] %v517_v1, 128 }
 0x14a   :  { %713 = vxpose.xlu1.b32.cont [13/16] %v534_v7, 128  ;;  %665 = vxpose.xlu0.b32.cont [13/16] %v518_v24, 128 }
 0x14e   :  { %714 = vxpose.xlu1.b32.cont [14/16] %v535_v32, 128  ;;  %666 = vxpose.xlu0.b32.cont [14/16] %v519_v31, 128 }
 0x152   :  { %715 = vxpose.xlu1.b32.cont [15/16] %v536_v35, 128  ;;  %667 = vxpose.xlu0.b32.cont [15/16] %v520_v28, 128 }
 0x156   :  { %716 = vxpose.xlu1.b32.end [16/16] %v537_v38, 128  ;;  %668 = vxpose.xlu0.b32.end [16/16] %v521_v37, 128 }
 0x19a   :  { %v717_v18 = vpop.trf.xlu1  ;;  %v669_v39 = vpop.trf.xlu0 }
 0x19e   :  { %v718_v40 = vpop.trf.xlu1  ;;  %v670_v41 = vpop.trf.xlu0 }
 0x1a2   :  { %v719_v60 = vpop.trf.xlu1  ;;  %v671_v42 = vpop.trf.xlu0 }
 0x1a6   :  { %v720_v43 = vpop.trf.xlu1  ;;  %v672_v44 = vpop.trf.xlu0 }
 0x1aa   :  { %v721_v45 = vpop.trf.xlu1  ;;  %v673_v46 = vpop.trf.xlu0 }
 0x1ab   :  { %v755_v5 = vmin.f32 %v717_v18, %v721_v45  ;;  %v733_v6 = vmax.f32 %v669_v39, %v673_v46 }
 0x1ae   :  { %v722_v47 = vpop.trf.xlu1  ;;  %v674_v26 = vpop.trf.xlu0 }
 0x1af   :  { %v756_v0 = vmin.f32 %v718_v40, %v722_v47  ;;  %v734_v3 = vmax.f32 %v670_v41, %v674_v26 }
 0x1b2   :  { %v723_v48 = vpop.trf.xlu1  ;;  %v675_v49 = vpop.trf.xlu0 }
 0x1b3   :  { %v757_v4 = vmin.f32 %v719_v60, %v723_v48  ;;  %v735_v8 = vmax.f32 %v671_v42, %v675_v49 }
 0x1b6   :  { %v724_v50 = vpop.trf.xlu1  ;;  %v676_v2 = vpop.trf.xlu0 }
 0x1b7   :  { %v758_v12 = vmin.f32 %v720_v43, %v724_v50  ;;  %v736_v13 = vmax.f32 %v672_v44, %v676_v2 }
 0x1ba   :  { %v725_v51 = vpop.trf.xlu1  ;;  %v677_v52 = vpop.trf.xlu0 }
 0x1bb   :  { %v759_v10 = vmin.f32 %v755_v5, %v725_v51  ;;  %v737_v16 = vmax.f32 %v733_v6, %v677_v52 }
 0x1be   :  { %v726_v53 = vpop.trf.xlu1  ;;  %v678_v54 = vpop.trf.xlu0 }
 0x1bf   :  { %v760_v14 = vmin.f32 %v756_v0, %v726_v53  ;;  %v738_v15 = vmax.f32 %v734_v3, %v678_v54 }
 0x1c2   :  { %v727_v55 = vpop.trf.xlu1  ;;  %v679_v56 = vpop.trf.xlu0 }
 0x1c3   :  { %v761_v17 = vmin.f32 %v757_v4, %v727_v55  ;;  %v739_v1 = vmax.f32 %v735_v8, %v679_v56 }
 0x1c6   :  { %v728_v57 = vpop.trf.xlu1  ;;  %v680_v58 = vpop.trf.xlu0 }
 0x1c7   :  { %v762_v19 = vmin.f32 %v758_v12, %v728_v57  ;;  %v740_v20 = vmax.f32 %v736_v13, %v680_v58 }
 0x1ca   :  { %v729_v59 = vpop.trf.xlu1  ;;  %v681_v61 = vpop.trf.xlu0 }
 0x1cb   :  { %v763_v24 = vmin.f32 %v759_v10, %v729_v59  ;;  %v741_v7 = vmax.f32 %v737_v16, %v681_v61 }
 0x1ce   :  { %v730_v62 = vpop.trf.xlu1  ;;  %v682_v63 = vpop.trf.xlu0 }
 0x1cf   :  { %v764_v21 = vmin.f32 %v760_v14, %v730_v62  ;;  %v742_v22 = vmax.f32 %v738_v15, %v682_v63 }
 0x1d1   :  { %v767_v32 = vmin.f32 %v763_v24, %v764_v21  ;;  %v745_v33 = vmax.f32 %v741_v7, %v742_v22 }
 0x1d2   :  { %v731_v9 = vpop.trf.xlu1  ;;  %v683_v11 = vpop.trf.xlu0 }
 0x1d3   :  { %v765_v29 = vmin.f32 %v761_v17, %v731_v9  ;;  %v743_v30 = vmax.f32 %v739_v1, %v683_v11 }
 0x1d6   :  { %v732_v25 = vpop.trf.xlu1  ;;  %v684_v27 = vpop.trf.xlu0 }
 0x1d7   :  { %v766_v23 = vmin.f32 %v762_v19, %v732_v25  ;;  %v744_v31 = vmax.f32 %v740_v20, %v684_v27 }
 0x1d9   :  { %v768_v34 = vmin.f32 %v765_v29, %v766_v23  ;;  %v746_v28 = vmax.f32 %v743_v30, %v744_v31 }
 0x1db   :  { %v769_v35 = vmin.f32 %v767_v32, %v768_v34  ;;  %v747_v36 = vmax.f32 %v745_v33, %v746_v28 }
 0x1dd   :  { %v770_v37 = vrot.slane %v769_v35, 4  ;;  %v748_v38 = vrot.slane %v747_v36, 4 }
 0x1df   :  { %v771_v18 = vmin.f32 %v769_v35, %v770_v37  ;;  %v749_v39 = vmax.f32 %v747_v36, %v748_v38 }
 0x1e1   :  { %v772_v40 = vrot.slane %v771_v18, 2  ;;  %v750_v41 = vrot.slane %v749_v39, 2 }
 0x1e3   :  { %v773_v60 = vmin.f32 %v771_v18, %v772_v40  ;;  %v751_v42 = vmax.f32 %v749_v39, %v750_v41 }
 0x1e5   :  { %v774_v43 = vrot.slane %v773_v60, 1  ;;  %v752_v44 = vrot.slane %v751_v42, 1 }
 0x1e7   :  { %v775_v45 = vmin.f32 %v773_v60, %v774_v43  ;;  %v753_v46 = vmax.f32 %v751_v42, %v752_v44 }
 0x1e9   :  { %v776_v47 = vmul.f32 2.0, %v775_v45  ;;  %v754_v26 = vmul.f32 2.0, %v753_v46 }
 0x1eb   :  { %v785_v48 = vmax.f32 %v776_v47, 1e-06  ;;  %v777_v49 = vmax.f32 %v754_v26, 1e-06 }
 0x1ed   :  { %913 = vrsqrt.f32 %v777_v49  ;;  %vm780_vm0 = vcmp.eq.f32.partialorder %v777_v49, inf  ;;  %v783_v52 = vand.u32 2147483648, %v777_v49  ;;  %vm782_vm1 = vcmp.eq.f32.partialorder %v777_v49, 0.0 }
 0x1ee   :  { %915 = vrsqrt.f32 %v785_v48  ;;  %vm788_vm2 = vcmp.eq.f32.partialorder %v785_v48, inf  ;;  %v791_v55 = vand.u32 2147483648, %v785_v48  ;;  %vm790_vm3 = vcmp.eq.f32.partialorder %v785_v48, 0.0 }
 0x1f7   :  { %v914_v50 = vpop.eup %913 }
 0x1f8   :  { %v916_v2 = vpop.eup %915  ;;  %v779_v51 = vmul.f32 %v914_v50, %v777_v49 }
 0x1f9   :  { %v787_v53 = vmul.f32 %v916_v2, %v785_v48 }
 0x1fa   :  { %v781_v54 = vsel %vm780_vm0, %v777_v49, %v779_v51 }
 0x1fb   :  { %v784_v56 = vsel %vm782_vm1, %v783_v52, %v781_v54  ;;  %v789_v57 = vsel %vm788_vm2, %v785_v48, %v787_v53 }
 0x1fc   :  { %v792_v58 = vsel %vm790_vm3, %v791_v55, %v789_v57 }
 0x1fd   :  { %v793_v59 = vsub.f32 %v784_v56, %v792_v58 }
 0x1ff   :  { %v794_v61 = vadd.f32 1.0, %v793_v59 }
 0x201   :  { %v795_v62 = vmax.f32 %v794_v61, 0.0 }
 0x203   :  { %796 = vst [vmem:[#allocation4] sm:$0x1] %v795_v62 }
 0x204   :  { %928 = shalt.err (!%p925_p4)
}
 0x205   :  { %s929_s24 = scalar_lea.hbm %s1209_s6, 16 }
 0x206   :  { %p930_p5 = scmp.ne.s32.totalorder %s1209_s6, %s929_s24  ;;  %p933_p6 = scmp.lt.u32.totalorder %s929_s24, %s1209_s6 }
 0x208   :  { %p935_p7 = pnand %p933_p6, %p930_p5 }
 0x20a   :  { %938 = shalt.err (!%p935_p7)
}
 0x20b   :  { %806 = dma.vmem_to_hbm [thread:$0]  %s804_s5, 16, %s1209_s6, [#allocation5]  }
 0x20c   :  { %939 = dma.done.wait [#allocation5], 16  }
 0x20d   :  { %940 = vsyncadd [#allocation5], 4294967280 }
 0x20e   :  { %810 = vsyncpa [#allocation5], 1 }

</bundles_post_ra>
